<compile_context>
chip_gen: v7x
topology: tpu7x:2x2x1
jax: 0.10.0
libtpu: 0.0.40
codegen_flags: <defaults>
</compile_context>

<pallas_src>
import functools

import jax
import jax.numpy as jnp
from jax.experimental import pallas as pl
from jax.experimental.pallas import tpu as pltpu


def _round_up(n, m):
    return ((n + m - 1) // m) * m


# ----------------------------------------------------------------------------
# Fused forward kernel.
#   per K step:   soft_w_tile = soft_threshold(phi_tile @ b)   (on-chip)
#                 acc        += x_tile @ soft_w_tile
#   epilogue:     h   = relu(sigma * acc + eta)
#                 out = h @ zeta + w @ alpha
# ----------------------------------------------------------------------------
def _bnnstgp_kernel(sigma_ref, x_ref, phi_ref, b_ref, w_ref, eta_ref,
                    zeta_ref, alpha_ref, out_ref, acc_ref, *, lamb):
    k = pl.program_id(1)

    @pl.when(k == 0)
    def _init():
        acc_ref[...] = jnp.zeros_like(acc_ref)

    # On-chip soft-thresholded hidden-weight tile (TK, Hp), f32.
    pb = jnp.dot(phi_ref[...], b_ref[...], preferred_element_type=jnp.float32)
    lamb_f = jnp.float32(lamb)
    # F.threshold(pb, lamb, lamb) - F.threshold(-pb, lamb, lamb)
    soft = (jnp.where(pb > lamb_f, pb, lamb_f)
            - jnp.where(-pb > lamb_f, -pb, lamb_f))

    acc_ref[...] += jnp.dot(x_ref[...], soft.astype(jnp.bfloat16),
                            preferred_element_type=jnp.float32)

    @pl.when(k == pl.num_programs(1) - 1)
    def _finalize():
        h = jnp.maximum(sigma_ref[0] * acc_ref[...] + eta_ref[...], 0.0)
        out = (jnp.dot(h.astype(jnp.bfloat16), zeta_ref[...],
                       preferred_element_type=jnp.float32)
               + jnp.dot(w_ref[...], alpha_ref[...],
                         preferred_element_type=jnp.float32))
        out_ref[...] = out.astype(out_ref.dtype)


def bnnstgp_forward(x, w, phi, b, zeta, alpha, eta, sigma, *, lamb=1.0,
                    batch_tile=256, k_tile=2048):
    """Pallas forward: pad (bf16-first), single fused gridded kernel."""
    B, input_dim = x.shape
    n_knots, n_hid = b.shape
    w_dim, output_dim = alpha.shape

    bf16 = jnp.bfloat16

    # Padded / tiled sizes (zero padding is exact for this computation).
    Kp = _round_up(n_knots, 16)              # bf16 sublane packing only (NOT 128)
    Hp = _round_up(n_hid, 256 if n_hid >= 256 else 128)  # full MXU lanes when big
    Wp = _round_up(w_dim, 128)
    Op = _round_up(output_dim, 128)

    Ip = _round_up(input_dim, 128)
    TK = min(k_tile, Ip)                     # input_dim (reduction) tile
    Ip = _round_up(Ip, TK)

    Bp = _round_up(B, 8)
    BT = Bp if Bp <= batch_tile else batch_tile   # batch tile
    Bp = _round_up(Bp, BT)

    nb, nk = Bp // BT, Ip // TK

    def pad2(a, r, c, dt):
        a = jnp.asarray(a, dt)               # cast BEFORE padding (no f32 blowup)
        return jnp.pad(a, ((0, r - a.shape[0]), (0, c - a.shape[1])))

    x_p = pad2(x, Bp, Ip, bf16)
    w_p = pad2(w, Bp, Wp, bf16)
    phi_p = pad2(phi, Ip, Kp, bf16)
    b_p = pad2(b, Kp, Hp, bf16)
    zeta_p = pad2(zeta, Hp, Op, bf16)
    alpha_p = pad2(alpha, Wp, Op, bf16)
    eta_p = jnp.pad(jnp.asarray(eta, jnp.float32).reshape(1, -1),
                    ((0, 0), (0, Hp - n_hid)))
    sigma_arr = jnp.asarray(sigma, jnp.float32).reshape(1)

    smem = pl.BlockSpec(memory_space=pltpu.MemorySpace.SMEM)

    out_p = pl.pallas_call(
        functools.partial(_bnnstgp_kernel, lamb=float(lamb)),
        out_shape=jax.ShapeDtypeStruct((Bp, Op), jnp.float32),
        grid_spec=pltpu.PrefetchScalarGridSpec(
            num_scalar_prefetch=0,
            grid=(nb, nk),
            in_specs=[
                smem,                                                # sigma (SMEM)
                pl.BlockSpec((BT, TK), lambda bi, ki: (bi, ki)),     # x tile
                pl.BlockSpec((TK, Kp), lambda bi, ki: (ki, 0)),      # phi tile
                pl.BlockSpec((Kp, Hp), lambda bi, ki: (0, 0)),       # b (resident)
                pl.BlockSpec((BT, Wp), lambda bi, ki: (bi, 0)),      # w (per batch tile)
                pl.BlockSpec((1, Hp), lambda bi, ki: (0, 0)),        # eta
                pl.BlockSpec((Hp, Op), lambda bi, ki: (0, 0)),       # zeta
                pl.BlockSpec((Wp, Op), lambda bi, ki: (0, 0)),       # alpha
            ],
            out_specs=pl.BlockSpec((BT, Op), lambda bi, ki: (bi, 0)),
            scratch_shapes=[pltpu.VMEM((BT, Hp), jnp.float32)],
        ),
        compiler_params=pltpu.CompilerParams(
            dimension_semantics=("parallel", "arbitrary"),
            vmem_limit_bytes=32 * 1024 * 1024),
        cost_estimate=pl.CostEstimate(
            flops=2 * (nb * Ip * Kp * Hp            # on-chip soft_w recompute
                       + Bp * Ip * Hp               # main reduction
                       + Bp * (Hp + Wp) * Op),      # epilogue
            transcendentals=0,
            bytes_accessed=(2 * (Bp * Ip + nb * Ip * Kp + Kp * Hp + Bp * Wp
                                 + Hp * Op + Wp * Op)
                            + 4 * (Hp + Bp * Op))),
    )(sigma_arr, x_p, phi_p, b_p, w_p, eta_p, zeta_p, alpha_p)

    return out_p[:B, :output_dim]


def bnnstgp_reference(x, w, phi, b, zeta, alpha, eta, sigma, *, lamb=1.0):
    """Pure-JAX f32 reference mirroring the PyTorch forward exactly."""
    out = phi @ b
    out = jnp.where(out > lamb, out, lamb) - jnp.where(-out > lamb, -out, lamb)
    out = sigma * out
    out = x @ out + eta
    out = jnp.maximum(out, 0.0)
    return out @ zeta + w @ alpha


if __name__ == "__main__":
    # Small, module-consistent shapes.
    batch = 8
    input_dim = 16      # number of voxels / image features (x columns)
    n_knots = 8
    n_hid = 32
    w_dim = 4           # confounder covariates
    output_dim = 1
    lamb = 1.0

    key = jax.random.PRNGKey(0)
    k_phi, k_b, k_zeta, k_alpha, k_x, k_w = jax.random.split(key, 6)

    # Deterministic parameter init matching the constructor's distributions.
    phi = jax.random.normal(k_phi, (input_dim, n_knots), jnp.float32)
    b = jax.random.normal(k_b, (n_knots, n_hid), jnp.float32)                 # N(0, 1)
    zeta = 0.2 * jax.random.normal(k_zeta, (n_hid, output_dim), jnp.float32)  # N(0, 0.2)
    eta = jnp.zeros((n_hid,), jnp.float32)
    reg_init = 0.1 * jax.random.normal(k_alpha, (w_dim * output_dim,), jnp.float32)
    alpha = reg_init.reshape(w_dim, output_dim)
    sigma = jnp.float32(0.1)

    # Inputs.
    x = jax.random.normal(k_x, (batch, input_dim), jnp.float32)
    w = jax.random.normal(k_w, (batch, w_dim), jnp.float32)

    out = bnnstgp_forward(x, w, phi, b, zeta, alpha, eta, sigma, lamb=lamb)
    out = jax.block_until_ready(out)

    ref = bnnstgp_reference(x, w, phi, b, zeta, alpha, eta, sigma, lamb=lamb)
    assert out.shape == (batch, output_dim), out.shape
    # bf16 MXU operands -> compare against the f32 reference with bf16-level tolerance.
    assert jnp.allclose(out, ref, atol=5e-2, rtol=5e-2), (
        f"max abs err = {jnp.max(jnp.abs(out - ref))}")

    print("KERNEL_OK")
</pallas_src>

<mosaic_0001>
module attributes {stable_mosaic.version = 11 : i64} {
  func.func @_bnnstgp_kernel(%arg0: i32, %arg1: i32, %arg2: memref<1xf32, #tpu.memory_space<smem>>, %arg3: memref<8x128xbf16, #tpu.memory_space<vmem>>, %arg4: memref<128x16xbf16, #tpu.memory_space<vmem>>, %arg5: memref<16x128xbf16, #tpu.memory_space<vmem>>, %arg6: memref<8x128xbf16, #tpu.memory_space<vmem>>, %arg7: memref<1x128xf32, #tpu.memory_space<vmem>>, %arg8: memref<128x128xbf16, #tpu.memory_space<vmem>>, %arg9: memref<128x128xbf16, #tpu.memory_space<vmem>>, %arg10: memref<8x128xf32, #tpu.memory_space<vmem>>, %arg11: memref<8x128xf32, #tpu.memory_space<vmem>>) attributes {dimension_semantics = [#tpu.dimension_semantics<parallel>, #tpu.dimension_semantics<arbitrary>], iteration_bounds = array<i64: 1, 1>, scalar_prefetch = 0 : i64, scratch_operands = 1 : i64, tpu.core_type = #tpu.core_type<tc>, window_params = [{transform_indices = @transform_0, window_bounds = array<i64: 1>}, {transform_indices = @transform_1, window_bounds = array<i64: 8, 128>}, {transform_indices = @transform_2, window_bounds = array<i64: 128, 16>}, {pipeline_mode = #tpu.pipeline_mode<synchronous>, transform_indices = @transform_3, window_bounds = array<i64: 16, 128>}, {transform_indices = @transform_4, window_bounds = array<i64: 8, 128>}, {pipeline_mode = #tpu.pipeline_mode<synchronous>, transform_indices = @transform_5, window_bounds = array<i64: 1, 128>}, {pipeline_mode = #tpu.pipeline_mode<synchronous>, transform_indices = @transform_6, window_bounds = array<i64: 128, 128>}, {pipeline_mode = #tpu.pipeline_mode<synchronous>, transform_indices = @transform_7, window_bounds = array<i64: 128, 128>}, {transform_indices = @transform_8, window_bounds = array<i64: 8, 128>}]} {
    %c0_i32 = arith.constant 0 : i32
    %0 = arith.cmpi eq, %arg1, %c0_i32 : i32
    %1 = arith.extui %0 : i1 to i32
    %c0_i32_0 = arith.constant 0 : i32
    %2 = arith.cmpi ne, %1, %c0_i32_0 : i32
    scf.if %2 {
      %cst_19 = arith.constant 0.000000e+00 : f32
      %28 = vector.broadcast %cst_19 : f32 to vector<8x128xf32>
      %c0_20 = arith.constant 0 : index
      %c0_21 = arith.constant 0 : index
      %29 = vector.load %arg11[%c0_20, %c0_21] : memref<8x128xf32, #tpu.memory_space<vmem>>, vector<8x128xf32>
      tpu.vector_store %arg11[%c0_20, %c0_21], %28 {strides = array<i32>} : memref<8x128xf32, #tpu.memory_space<vmem>>, vector<8x128xf32>,
    } else {
    }
    %c0 = arith.constant 0 : index
    %c0_1 = arith.constant 0 : index
    %3 = vector.load %arg4[%c0, %c0_1] : memref<128x16xbf16, #tpu.memory_space<vmem>>, vector<128x16xbf16>
    %c0_2 = arith.constant 0 : index
    %c0_3 = arith.constant 0 : index
    %4 = vector.load %arg5[%c0_2, %c0_3] : memref<16x128xbf16, #tpu.memory_space<vmem>>, vector<16x128xbf16>
    %cst = arith.constant dense<0.000000e+00> : vector<128x128xf32>
    %5 = tpu.matmul %3, %4, %cst {dimension_numbers = #tpu.dot_dimension_numbers<[1], [0], [0], [1], [0, 0, 1, 1], [], []>} : vector<128x16xbf16>, vector<16x128xbf16>, vector<128x128xf32> -> vector<128x128xf32>
    %cst_4 = arith.constant 1.000000e+00 : f32
    %6 = vector.broadcast %cst_4 : f32 to vector<128x128xf32>
    %7 = arith.cmpf ogt, %5, %6 : vector<128x128xf32>
    %cst_5 = arith.constant 1.000000e+00 : f32
    %8 = vector.broadcast %cst_5 : f32 to vector<128x128xf32>
    %9 = arith.select %7, %5, %8 : vector<128x128xi1>, vector<128x128xf32>
    %cst_6 = arith.constant 0.000000e+00 : f32
    %10 = vector.broadcast %cst_6 : f32 to vector<128x128xf32>
    %11 = arith.subf %10, %5 : vector<128x128xf32>
    %cst_7 = arith.constant 1.000000e+00 : f32
    %12 = vector.broadcast %cst_7 : f32 to vector<128x128xf32>
    %13 = arith.cmpf ogt, %11, %12 : vector<128x128xf32>
    %cst_8 = arith.constant 0.000000e+00 : f32
    %14 = vector.broadcast %cst_8 : f32 to vector<128x128xf32>
    %15 = arith.subf %14, %5 : vector<128x128xf32>
    %cst_9 = arith.constant 1.000000e+00 : f32
    %16 = vector.broadcast %cst_9 : f32 to vector<128x128xf32>
    %17 = arith.select %13, %15, %16 : vector<128x128xi1>, vector<128x128xf32>
    %18 = arith.subf %9, %17 : vector<128x128xf32>
    %c0_10 = arith.constant 0 : index
    %c0_11 = arith.constant 0 : index
    %19 = vector.load %arg11[%c0_10, %c0_11] : memref<8x128xf32, #tpu.memory_space<vmem>>, vector<8x128xf32>
    %c0_12 = arith.constant 0 : index
    %c0_13 = arith.constant 0 : index
    %20 = vector.load %arg3[%c0_12, %c0_13] : memref<8x128xbf16, #tpu.memory_space<vmem>>, vector<8x128xbf16>
    %21 = arith.truncf %18 : vector<128x128xf32> to vector<128x128xbf16>
    %cst_14 = arith.constant dense<0.000000e+00> : vector<8x128xf32>
    %22 = tpu.matmul %20, %21, %cst_14 {dimension_numbers = #tpu.dot_dimension_numbers<[1], [0], [0], [1], [0, 0, 1, 1], [], []>} : vector<8x128xbf16>, vector<128x128xbf16>, vector<8x128xf32> -> vector<8x128xf32>
    %23 = arith.addf %19, %22 : vector<8x128xf32>
    %c0_15 = arith.constant 0 : index
    %c0_16 = arith.constant 0 : index
    %24 = vector.load %arg11[%c0_15, %c0_16] : memref<8x128xf32, #tpu.memory_space<vmem>>, vector<8x128xf32>
    tpu.vector_store %arg11[%c0_15, %c0_16], %23 {strides = array<i32>} : memref<8x128xf32, #tpu.memory_space<vmem>>, vector<8x128xf32>,
    %c0_i32_17 = arith.constant 0 : i32
    %25 = arith.cmpi eq, %arg1, %c0_i32_17 : i32
    %26 = arith.extui %25 : i1 to i32
    %c0_i32_18 = arith.constant 0 : i32
    %27 = arith.cmpi ne, %26, %c0_i32_18 : i32
    scf.if %27 {
      %c0_19 = arith.constant 0 : index
      %28 = memref.load %arg2[%c0_19] : memref<1xf32, #tpu.memory_space<smem>>
      %c0_20 = arith.constant 0 : index
      %c0_21 = arith.constant 0 : index
      %29 = vector.load %arg11[%c0_20, %c0_21] : memref<8x128xf32, #tpu.memory_space<vmem>>, vector<8x128xf32>
      %30 = vector.broadcast %28 : f32 to vector<8x128xf32>
      %31 = arith.mulf %30, %29 : vector<8x128xf32>
      %c0_22 = arith.constant 0 : index
      %c0_23 = arith.constant 0 : index
      %32 = vector.load %arg7[%c0_22, %c0_23] : memref<1x128xf32, #tpu.memory_space<vmem>>, vector<1x128xf32>
      %33 = vector.broadcast %32 : vector<1x128xf32> to vector<8x128xf32>
      %34 = arith.addf %31, %33 : vector<8x128xf32>
      %cst_24 = arith.constant 0.000000e+00 : f32
      %35 = vector.broadcast %cst_24 : f32 to vector<8x128xf32>
      %36 = arith.maximumf %34, %35 : vector<8x128xf32>
      %37 = arith.truncf %36 : vector<8x128xf32> to vector<8x128xbf16>
      %c0_25 = arith.constant 0 : index
      %c0_26 = arith.constant 0 : index
      %38 = vector.load %arg8[%c0_25, %c0_26] : memref<128x128xbf16, #tpu.memory_space<vmem>>, vector<128x128xbf16>
      %cst_27 = arith.constant dense<0.000000e+00> : vector<8x128xf32>
      %39 = tpu.matmul %37, %38, %cst_27 {dimension_numbers = #tpu.dot_dimension_numbers<[1], [0], [0], [1], [0, 0, 1, 1], [], []>} : vector<8x128xbf16>, vector<128x128xbf16>, vector<8x128xf32> -> vector<8x128xf32>
      %c0_28 = arith.constant 0 : index
      %c0_29 = arith.constant 0 : index
      %40 = vector.load %arg6[%c0_28, %c0_29] : memref<8x128xbf16, #tpu.memory_space<vmem>>, vector<8x128xbf16>
      %c0_30 = arith.constant 0 : index
      %c0_31 = arith.constant 0 : index
      %41 = vector.load %arg9[%c0_30, %c0_31] : memref<128x128xbf16, #tpu.memory_space<vmem>>, vector<128x128xbf16>
      %cst_32 = arith.constant dense<0.000000e+00> : vector<8x128xf32>
      %42 = tpu.matmul %40, %41, %cst_32 {dimension_numbers = #tpu.dot_dimension_numbers<[1], [0], [0], [1], [0, 0, 1, 1], [], []>} : vector<8x128xbf16>, vector<128x128xbf16>, vector<8x128xf32> -> vector<8x128xf32>
      %43 = arith.addf %39, %42 : vector<8x128xf32>
      %c0_33 = arith.constant 0 : index
      %c0_34 = arith.constant 0 : index
      %44 = vector.load %arg10[%c0_33, %c0_34] : memref<8x128xf32, #tpu.memory_space<vmem>>, vector<8x128xf32>
      tpu.vector_store %arg10[%c0_33, %c0_34], %43 {strides = array<i32>} : memref<8x128xf32, #tpu.memory_space<vmem>>, vector<8x128xf32>,
    } else {
    }
    return
  }
  func.func @transform_0(%arg0: i32, %arg1: i32) -> i32 {
    %c0_i32 = arith.constant 0 : i32
    %c0_i32_0 = arith.constant 0 : i32
    return %c0_i32 : i32
  }
  func.func @transform_1(%arg0: i32, %arg1: i32) -> (i32, i32) {
    %c0_i32 = arith.constant 0 : i32
    return %arg0, %arg1 : i32, i32
  }
  func.func @transform_2(%arg0: i32, %arg1: i32) -> (i32, i32) {
    %c0_i32 = arith.constant 0 : i32
    %c0_i32_0 = arith.constant 0 : i32
    return %arg1, %c0_i32 : i32, i32
  }
  func.func @transform_3(%arg0: i32, %arg1: i32) -> (i32, i32) {
    %c0_i32 = arith.constant 0 : i32
    %c0_i32_0 = arith.constant 0 : i32
    %c0_i32_1 = arith.constant 0 : i32
    return %c0_i32, %c0_i32_0 : i32, i32
  }
  func.func @transform_4(%arg0: i32, %arg1: i32) -> (i32, i32) {
    %c0_i32 = arith.constant 0 : i32
    %c0_i32_0 = arith.constant 0 : i32
    return %arg0, %c0_i32 : i32, i32
  }
  func.func @transform_5(%arg0: i32, %arg1: i32) -> (i32, i32) {
    %c0_i32 = arith.constant 0 : i32
    %c0_i32_0 = arith.constant 0 : i32
    %c0_i32_1 = arith.constant 0 : i32
    return %c0_i32, %c0_i32_0 : i32, i32
  }
  func.func @transform_6(%arg0: i32, %arg1: i32) -> (i32, i32) {
    %c0_i32 = arith.constant 0 : i32
    %c0_i32_0 = arith.constant 0 : i32
    %c0_i32_1 = arith.constant 0 : i32
    return %c0_i32, %c0_i32_0 : i32, i32
  }
  func.func @transform_7(%arg0: i32, %arg1: i32) -> (i32, i32) {
    %c0_i32 = arith.constant 0 : i32
    %c0_i32_0 = arith.constant 0 : i32
    %c0_i32_1 = arith.constant 0 : i32
    return %c0_i32, %c0_i32_0 : i32, i32
  }
  func.func @transform_8(%arg0: i32, %arg1: i32) -> (i32, i32) {
    %c0_i32 = arith.constant 0 : i32
    %c0_i32_0 = arith.constant 0 : i32
    return %arg0, %c0_i32 : i32, i32
  }
}

</mosaic_0001>

<bundles_post_ra>
// kernel: tpu_custom_call.1
= control target key start
LH: loop header
LB: loop body
LE: loop exit
PB: predicated region body
PF: predicated region fallthrough
CT: control target
= control target key end

     0   :  { %14 = vsyncpa [#allocation5], 0  ;;  %s1034_s0 = inlined_call_operand.<no memory space> [shape: f32[1], index: 0, kind: input, shape index: {}]   ;;  %s1035_s1 = inlined_call_operand.vmem [shape: bf16[8,128], index: 1, kind: input, shape index: {}]   ;;  %s1036_s2 = inlined_call_operand.vmem [shape: bf16[128,16], index: 2, kind: input, shape index: {}]   ;;  %s1037_s3 = inlined_call_operand.vmem [shape: bf16[16,128], index: 3, kind: input, shape index: {}]   ;;  %s1038_s4 = inlined_call_operand.vmem [shape: bf16[8,128], index: 4, kind: input, shape index: {}]   ;;  %s1039_s5 = inlined_call_operand.vmem [shape: f32[1,128], index: 5, kind: input, shape index: {}]   ;;  %s1040_s6 = inlined_call_operand.vmem [shape: bf16[128,128], index: 6, kind: input, shape index: {}]   ;;  %s1041_s7 = inlined_call_operand.hbm [shape: bf16[128,128], index: 7, kind: input, shape index: {}]   ;;  %s1042_s8 = inlined_call_operand.hbm [shape: f32[8,128], index: 8, kind: output, shape index: {}]  }
   0x1   :  { %15 = vsyncpa [#allocation6], 0  ;;  %s858_s27 = smov [#allocation4]   ;;  %s810_s9 = scalar_lea.hbm %s1041_s7, 1024 }
   0x2   :  { %s35_s28 = sshll.u32 %s858_s27, 4  ;;  %p811_p0 = scmp.ne.s32.totalorder %s1041_s7, %s810_s9  ;;  %s36_s28 = int_to_ptr.vmem [resolvable:$true] %s35_s28 }
   0x3   :  { %p814_p1 = scmp.lt.u32.totalorder %s810_s9, %s1041_s7 }
   0x5   :  { %p816_p2 = pnand %p814_p1, %p811_p0 }
   0x7   :  { %819 = shalt.err (!%p816_p2)
}
   0x8   :  { %s820_s14 = scalar_lea.vmem %s36_s28, 1024  ;;  %p825_p4 = scmp.lt.s32.totalorder %s36_s28, %s36_s28 }
   0x9   :  { %p821_p3 = scmp.ne.s32.totalorder %s36_s28, %s820_s14  ;;  %p826_p5 = scmp.lt.s32.totalorder %s820_s14, %s820_s14 }
   0xb   :  { %p827_p6 = por %p826_p5, %p825_p4 }
   0xd   :  { %p828_p7 = pnand %p827_p6, %p821_p3 }
   0xf   :  { %831 = shalt.err (!%p828_p7)
}
  0x10   :  { %s859_s15 = smov 64   ;;  %s860_s16 = smov 4  }
  0x11   :  { %41 = dma.hbm_to_vmem [thread:$0]  %s1041_s7, 1024, %s36_s28, [#allocation5], %s859_s15, %s859_s15, %s860_s16  }
  0x12   :  { %854 = dma.done.wait [#allocation5], 1024  }
  0x13   :  { %855 = vsyncadd [#allocation5], 4294966272  ;;  %v785_v0 = vld [vmem:[%s1037_s3] sm:$0xff]   ;;  %vm115_vm0 = vcmask 130048   ;;  %v787_v2 = vld [vmem:[%s1036_s2 + $0x8] sm:$0xff]   ;;  %v861_v9 = vmov 0.0  }
  0x14   :  { %v786_v1 = vld [vmem:[%s1036_s2] sm:$0xff]   ;;  %697 = vmatprep.subr.bf16.mxu1 %v785_v0  ;;  %v788_v3 = vld [vmem:[%s1036_s2 + $0x10] sm:$0xff]   ;;  %v789_v4 = vld [vmem:[%s1036_s2 + $0x18] sm:$0xff]   ;;  %735 = vmatprep.subr.bf16.mxu0 %v861_v9  ;;  %vm862_vm1 = vmmov 0   ;;  %s863_s10 = smov [#allocation7]  }
  0x15   :  { %698 = vmatpush3.bf16.msra.mxu1 %v785_v0  ;;  %699 = vmatprep.mubr.msk.bf16.mxu1 %vm115_vm0, %v786_v1  ;;  %v790_v5 = vld [vmem:[%s1036_s2 + $0x20] sm:$0xff]   ;;  %v791_v6 = vld [vmem:[%s1036_s2 + $0x28] sm:$0xff]   ;;  %v792_v7 = vld [vmem:[%s1036_s2 + $0x30] sm:$0xff]  }
  0x16   :  { %v793_v8 = vld [vmem:[%s1036_s2 + $0x38] sm:$0xff]   ;;  %715 = vmatprep.subr.bf16.mxu1 %v861_v9  ;;  %751 = vmatprep.mubr.msk.bf16.mxu0 %vm862_vm1, %v861_v9  ;;  %v794_v10 = vld [vmem:[#allocation4] sm:$0xff]   ;;  %v795_v11 = vld [vmem:[#allocation4 + $0x8] sm:$0xff]  }
  0x17   :  { %736 = vmatpush3.bf16.msra.mxu0 %v794_v10  ;;  %v796_v12 = vld [vmem:[#allocation4 + $0x10] sm:$0xff]   ;;  %v797_v13 = vld [vmem:[#allocation4 + $0x18] sm:$0xff]   ;;  %v798_v14 = vld [vmem:[#allocation4 + $0x20] sm:$0xff]  }
  0x18   :  { %700 = vmatmul.mubr.msk.bf16.vlgmr.msra.gmra.mrb[0].mxu1 %vm115_vm0, %v787_v2  ;;  %737 = vmatprep.subr.bf16.mxu0 %v861_v9  ;;  %v799_v15 = vld [vmem:[#allocation4 + $0x28] sm:$0xff]   ;;  %v800_v16 = vld [vmem:[#allocation4 + $0x30] sm:$0xff]   ;;  %v801_v17 = vld [vmem:[#allocation4 + $0x38] sm:$0xff]  }
  0x19   :  { %703 = vmatprep.mubr.msk.bf16.mxu1 %vm115_vm0, %v788_v3  ;;  %v418_v18 = vld [vmem:[%s1038_s4] sm:$0xf]  ;;  %v803_v20 = vld [vmem:[%s1040_s6 + $0x8] sm:$0xff]   ;;  %v804_v21 = vld [vmem:[%s1040_s6 + $0x10] sm:$0xff]  }
  0x1a   :  { %v802_v19 = vld [vmem:[%s1040_s6] sm:$0xff]   ;;  %v805_v22 = vld [vmem:[%s1040_s6 + $0x18] sm:$0xff]   ;;  %v807_v24 = vld [vmem:[%s1040_s6 + $0x28] sm:$0xff]  }
  0x1b   :  { %738 = vmatpush3.bf16.msra.mxu0 %v795_v11  ;;  %v806_v23 = vld [vmem:[%s1040_s6 + $0x20] sm:$0xff]  }
  0x1c   :  { %739 = vmatprep.subr.bf16.mxu0 %v861_v9 }
  0x1f   :  { %740 = vmatpush3.bf16.msra.mxu0 %v796_v12 }
  0x20   :  { %704 = vmatmul.mubr.msk.bf16.gmra.mrb[4].mxu1 %vm115_vm0, %v789_v4  ;;  %741 = vmatprep.subr.bf16.mxu0 %v861_v9 }
  0x21   :  { %707 = vmatprep.mubr.msk.bf16.mxu1 %vm115_vm0, %v790_v5 }
  0x23   :  { %742 = vmatpush3.bf16.msra.mxu0 %v797_v13 }
  0x24   :  { %743 = vmatprep.subr.bf16.mxu0 %v861_v9 }
  0x27   :  { %744 = vmatpush3.bf16.msra.mxu0 %v798_v14 }
  0x28   :  { %708 = vmatmul.mubr.msk.bf16.gmra.mrb[8].mxu1 %vm115_vm0, %v791_v6  ;;  %745 = vmatprep.subr.bf16.mxu0 %v861_v9 }
  0x29   :  { %711 = vmatprep.mubr.msk.bf16.mxu1 %vm115_vm0, %v792_v7 }
  0x2b   :  { %746 = vmatpush3.bf16.msra.mxu0 %v799_v15 }
  0x2c   :  { %747 = vmatprep.subr.bf16.mxu0 %v861_v9 }
  0x2f   :  { %748 = vmatpush3.bf16.msra.mxu0 %v800_v16 }
  0x30   :  { %712 = vmatmul.mubr.msk.bf16.gmra.mrb[12].mxu1 %vm115_vm0, %v793_v8  ;;  %749 = vmatprep.subr.bf16.mxu0 %v861_v9 }
  0x31   :  { %731 = vmatprep.mubr.msk.bf16.mxu1 %vm862_vm1, %v861_v9 }
  0x33   :  { %750 = vmatpush3.bf16.msra.mxu0 %v801_v17 }
  0x34   :  { %755 = vmatprep.subr.bf16.mxu0 %v861_v9 }
  0x36   :  { %752 = vmatmul.mubr.bf16.vlgmr.msra.gmra.mrb[0].mxu0 %v418_v18 }
  0x37   :  { %756 = vmatpush3.bf16.msra.mxu0 %v802_v19  ;;  %771 = vmatprep.mubr.msk.bf16.mxu0 %vm862_vm1, %v861_v9 }
  0x38   :  { %757 = vmatprep.subr.bf16.mxu0 %v861_v9 }
  0x3b   :  { %758 = vmatpush3.bf16.msra.mxu0 %v803_v20 }
  0x3c   :  { %759 = vmatprep.subr.bf16.mxu0 %v861_v9 }
  0x3f   :  { %760 = vmatpush3.bf16.msra.mxu0 %v804_v21 }
  0x40   :  { %761 = vmatprep.subr.bf16.mxu0 %v861_v9 }
  0x43   :  { %762 = vmatpush3.bf16.msra.mxu0 %v805_v22 }
  0x44   :  { %763 = vmatprep.subr.bf16.mxu0 %v861_v9 }
  0x47   :  { %764 = vmatpush3.bf16.msra.mxu0 %v806_v23 }
  0x48   :  { %765 = vmatprep.subr.bf16.mxu0 %v861_v9 }
  0x4b   :  { %766 = vmatpush3.bf16.msra.mxu0 %v807_v24 }
  0x4c   :  { %767 = vmatprep.subr.bf16.mxu0 %v861_v9 }
  0xeb   :  { %v701_v25 = vpop.f32.mrb[0].mxu1 }
  0xec   :  { %v271_v26 = vsub.f32 0.0, %v701_v25  ;;  %v174_v27 = vpop.f32.mrb[1].mxu1  ;;  %vm239_vm2 = vcmp.gt.f32.partialorder %v701_v25, 1.0 }
  0xed   :  { %v269_v28 = vsub.f32 0.0, %v174_v27  ;;  %v702_v29 = vpop.f32.mrb[2].mxu1  ;;  %v255_v33 = vsel %vm239_vm2, %v701_v25, 1.0  ;;  %vm237_vm6 = vcmp.gt.f32.partialorder %v174_v27, 1.0 }
  0xee   :  { %vm287_vm3 = vcmp.gt.f32.partialorder %v271_v26, 1.0  ;;  %vm240_vm4 = vcmp.gt.f32.partialorder %v702_v29, 1.0  ;;  %v272_v30 = vsub.f32 0.0, %v702_v29  ;;  %v177_v31 = vpop.f32.mrb[3].mxu1  ;;  %v253_v40 = vsel %vm237_vm6, %v174_v27, 1.0 }
  0xef   :  { %v303_v32 = vsel %vm287_vm3, %v271_v26, 1.0  ;;  %vm285_vm5 = vcmp.gt.f32.partialorder %v269_v28, 1.0  ;;  %v256_v34 = vsel %vm240_vm4, %v702_v29, 1.0  ;;  %vm238_vm8 = vcmp.gt.f32.partialorder %v177_v31, 1.0 }
  0xf0   :  { %vm288_vm7 = vcmp.gt.f32.partialorder %v272_v30, 1.0  ;;  %v270_v36 = vsub.f32 0.0, %v177_v31  ;;  %v319_v37 = vsub.f32 %v255_v33, %v303_v32  ;;  %v301_v38 = vsel %vm285_vm5, %v269_v28, 1.0 }
  0xf1   :  { %v304_v35 = vsel %vm288_vm7, %v272_v30, 1.0  ;;  %v254_v43 = vsel %vm238_vm8, %v177_v31, 1.0  ;;  %v317_v47 = vsub.f32 %v253_v40, %v301_v38 }
  0xf2   :  { %v320_v39 = vsub.f32 %v256_v34, %v304_v35  ;;  %vm286_vm9 = vcmp.gt.f32.partialorder %v270_v36, 1.0 }
  0xf3   :  { %v705_v41 = vpop.f32.mrb[4].mxu1  ;;  %v302_v44 = vsel %vm286_vm9, %v270_v36, 1.0 }
  0xf4   :  { %v336_v42 = vpack.c.bf16 %v320_v39, %v319_v37  ;;  %v275_v45 = vsub.f32 0.0, %v705_v41  ;;  %v190_v46 = vpop.f32.mrb[5].mxu1  ;;  %v318_v48 = vsub.f32 %v254_v43, %v302_v44  ;;  %vm243_vm10 = vcmp.gt.f32.partialorder %v705_v41, 1.0 }
  0xf5   :  { %v273_v49 = vsub.f32 0.0, %v190_v46  ;;  %v706_v50 = vpop.f32.mrb[6].mxu1  ;;  %v259_v55 = vsel %vm243_vm10, %v705_v41, 1.0  ;;  %vm241_vm14 = vcmp.gt.f32.partialorder %v190_v46, 1.0 }
  0xf6   :  { %vm291_vm11 = vcmp.gt.f32.partialorder %v275_v45, 1.0  ;;  %vm244_vm12 = vcmp.gt.f32.partialorder %v706_v50, 1.0  ;;  %v276_v51 = vsub.f32 0.0, %v706_v50  ;;  %v193_v52 = vpop.f32.mrb[7].mxu1  ;;  %v335_v53 = vpack.c.bf16 %v318_v48, %v317_v47 }
  0xf7   :  { %v307_v54 = vsel %vm291_vm11, %v275_v45, 1.0  ;;  %vm289_vm13 = vcmp.gt.f32.partialorder %v273_v49, 1.0  ;;  %v260_v56 = vsel %vm244_vm12, %v706_v50, 1.0  ;;  %vm242_vm0 = vcmp.gt.f32.partialorder %v193_v52, 1.0  ;;  %v334_v50 = vld [vmem:[%s1035_s1] sm:$0xf] }
  0xf8   :  { %vm292_vm15 = vcmp.gt.f32.partialorder %v276_v51, 1.0  ;;  %v274_v58 = vsub.f32 0.0, %v193_v52  ;;  %716 = vmatpush3.bf16.msra.mxu1 %v335_v53  ;;  %v323_v59 = vsub.f32 %v259_v55, %v307_v54  ;;  %v305_v60 = vsel %vm289_vm13, %v273_v49, 1.0  ;;  %v644_v55 = vld [vmem:[%s1039_s5] ss:$0 sm:$0xff] }
  0xf9   :  { %v308_v57 = vsel %vm292_vm15, %v276_v51, 1.0  ;;  %717 = vmatprep.subr.bf16.mxu1 %v861_v9  ;;  %v257_v62 = vsel %vm241_vm14, %v190_v46, 1.0  ;;  %v258_v1 = vsel %vm242_vm0, %v193_v52, 1.0  ;;  %v808_v51 = vld [vmem:[%s1040_s6 + $0x30] sm:$0xff]   ;;  %v809_v52 = vld [vmem:[%s1040_s6 + $0x38] sm:$0xff]   ;;  %v390_v53 = vstv %s1034_s0  ;;  %s618_s6 = sshll.u32 %s863_s10, 4  ;;  %s619_s6 = int_to_ptr.vmem [resolvable:$true] %s618_s6 }
  0xfa   :  { %v324_v61 = vsub.f32 %v260_v56, %v308_v57  ;;  %vm290_vm1 = vcmp.gt.f32.partialorder %v274_v58, 1.0  ;;  %v321_v5 = vsub.f32 %v257_v62, %v305_v60  ;;  %768 = vmatpush3.bf16.msra.mxu0 %v808_v51  ;;  %s832_s0 = scalar_lea.vmem %s619_s6, 128  ;;  %p837_p9 = scmp.lt.s32.totalorder %s619_s6, %s619_s6 }
  0xfb   :  { %v709_v63 = vpop.f32.mrb[8].mxu1  ;;  %v306_v2 = vsel %vm290_vm1, %v274_v58, 1.0  ;;  %769 = vmatprep.subr.bf16.mxu0 %v861_v9  ;;  %p833_p8 = scmp.ne.s32.totalorder %s619_s6, %s832_s0  ;;  %p838_p10 = scmp.lt.s32.totalorder %s832_s0, %s832_s0 }
  0xfc   :  { %v338_v0 = vpack.c.bf16 %v324_v61, %v323_v59  ;;  %v279_v3 = vsub.f32 0.0, %v709_v63  ;;  %v206_v4 = vpop.f32.mrb[9].mxu1  ;;  %v322_v6 = vsub.f32 %v258_v1, %v306_v2  ;;  %vm247_vm2 = vcmp.gt.f32.partialorder %v709_v63, 1.0  ;;  %718 = vmatpush3.bf16.msra.mxu1 %v336_v42 }
  0xfd   :  { %v277_v7 = vsub.f32 0.0, %v206_v4  ;;  %v710_v8 = vpop.f32.mrb[10].mxu1  ;;  %719 = vmatprep.subr.bf16.mxu1 %v861_v9  ;;  %v263_v14 = vsel %vm247_vm2, %v709_v63, 1.0  ;;  %vm245_vm6 = vcmp.gt.f32.partialorder %v206_v4, 1.0  ;;  %p839_p11 = por %p838_p10, %p837_p9 }
  0xfe   :  { %vm295_vm3 = vcmp.gt.f32.partialorder %v279_v3, 1.0  ;;  %vm248_vm4 = vcmp.gt.f32.partialorder %v710_v8, 1.0  ;;  %v280_v10 = vsub.f32 0.0, %v710_v8  ;;  %v209_v11 = vpop.f32.mrb[11].mxu1  ;;  %v337_v12 = vpack.c.bf16 %v322_v6, %v321_v5  ;;  %770 = vmatpush3.bf16.msra.mxu0 %v809_v52 }
  0xff   :  { %v311_v13 = vsel %vm295_vm3, %v279_v3, 1.0  ;;  %vm293_vm5 = vcmp.gt.f32.partialorder %v277_v7, 1.0  ;;  %v264_v15 = vsel %vm248_vm4, %v710_v8, 1.0  ;;  %vm246_vm8 = vcmp.gt.f32.partialorder %v209_v11, 1.0  ;;  %p840_p12 = pnand %p839_p11, %p833_p8 }
 0x100   :  { %vm296_vm7 = vcmp.gt.f32.partialorder %v280_v10, 1.0  ;;  %v278_v17 = vsub.f32 0.0, %v209_v11  ;;  %720 = vmatpush3.bf16.msra.mxu1 %v337_v12  ;;  %v327_v18 = vsub.f32 %v263_v14, %v311_v13  ;;  %v309_v19 = vsel %vm293_vm5, %v277_v7, 1.0 }
 0x101   :  { %v312_v16 = vsel %vm296_vm7, %v280_v10, 1.0  ;;  %721 = vmatprep.subr.bf16.mxu1 %v861_v9  ;;  %v261_v21 = vsel %vm245_vm6, %v206_v4, 1.0  ;;  %v262_v24 = vsel %vm246_vm8, %v209_v11, 1.0 }
 0x102   :  { %v328_v20 = vsub.f32 %v264_v15, %v312_v16  ;;  %vm294_vm9 = vcmp.gt.f32.partialorder %v278_v17, 1.0  ;;  %v325_v28 = vsub.f32 %v261_v21, %v309_v19 }
 0x103   :  { %v713_v22 = vpop.f32.mrb[12].mxu1  ;;  %v310_v25 = vsel %vm294_vm9, %v278_v17, 1.0 }
 0x104   :  { %v340_v23 = vpack.c.bf16 %v328_v20, %v327_v18  ;;  %v283_v26 = vsub.f32 0.0, %v713_v22  ;;  %v222_v27 = vpop.f32.mrb[13].mxu1  ;;  %v326_v29 = vsub.f32 %v262_v24, %v310_v25  ;;  %vm251_vm10 = vcmp.gt.f32.partialorder %v713_v22, 1.0  ;;  %722 = vmatpush3.bf16.msra.mxu1 %v338_v0 }
 0x105   :  { %v281_v30 = vsub.f32 0.0, %v222_v27  ;;  %v714_v31 = vpop.f32.mrb[14].mxu1  ;;  %723 = vmatprep.subr.bf16.mxu1 %v861_v9  ;;  %v267_v36 = vsel %vm251_vm10, %v713_v22, 1.0  ;;  %vm249_vm14 = vcmp.gt.f32.partialorder %v222_v27, 1.0 }
 0x106   :  { %vm299_vm11 = vcmp.gt.f32.partialorder %v283_v26, 1.0  ;;  %vm252_vm12 = vcmp.gt.f32.partialorder %v714_v31, 1.0  ;;  %v284_v32 = vsub.f32 0.0, %v714_v31  ;;  %v225_v33 = vpop.f32.mrb[15].mxu1  ;;  %v339_v34 = vpack.c.bf16 %v326_v29, %v325_v28 }
 0x107   :  { %v315_v35 = vsel %vm299_vm11, %v283_v26, 1.0  ;;  %vm297_vm13 = vcmp.gt.f32.partialorder %v281_v30, 1.0  ;;  %v268_v37 = vsel %vm252_vm12, %v714_v31, 1.0  ;;  %vm250_vm0 = vcmp.gt.f32.partialorder %v225_v33, 1.0 }
 0x108   :  { %vm300_vm15 = vcmp.gt.f32.partialorder %v284_v32, 1.0  ;;  %v282_v39 = vsub.f32 0.0, %v225_v33  ;;  %724 = vmatpush3.bf16.msra.mxu1 %v339_v34  ;;  %v331_v40 = vsub.f32 %v267_v36, %v315_v35  ;;  %v313_v41 = vsel %vm297_vm13, %v281_v30, 1.0 }
 0x109   :  { %v316_v38 = vsel %vm300_vm15, %v284_v32, 1.0  ;;  %725 = vmatprep.subr.bf16.mxu1 %v861_v9  ;;  %v265_v43 = vsel %vm249_vm14, %v222_v27, 1.0  ;;  %v266_v45 = vsel %vm250_vm0, %v225_v33, 1.0 }
 0x10a   :  { %v332_v42 = vsub.f32 %v268_v37, %v316_v38  ;;  %vm298_vm1 = vcmp.gt.f32.partialorder %v282_v39, 1.0  ;;  %v329_v47 = vsub.f32 %v265_v43, %v313_v41 }
 0x10b   :  { %v314_v46 = vsel %vm298_vm1, %v282_v39, 1.0 }
 0x10c   :  { %v342_v44 = vpack.c.bf16 %v332_v42, %v331_v40  ;;  %v330_v48 = vsub.f32 %v266_v45, %v314_v46  ;;  %726 = vmatpush3.bf16.msra.mxu1 %v340_v23 }
 0x10d   :  { %727 = vmatprep.subr.bf16.mxu1 %v861_v9 }
 0x10e   :  { %v341_v49 = vpack.c.bf16 %v330_v48, %v329_v47 }
 0x110   :  { %728 = vmatpush3.bf16.msra.mxu1 %v341_v49 }
 0x111   :  { %729 = vmatprep.subr.bf16.mxu1 %v861_v9 }
 0x114   :  { %730 = vmatpush3.bf16.msra.mxu1 %v342_v44 }
 0x117   :  { %732 = vmatmul.mubr.bf16.vlgmr.msra.gmra.mrb[16].mxu1 %v334_v50 }
 0x1ea   :  { %v377_v54 = vpop.f32.mrb[16].mxu1 }
 0x1eb   :  { %v391_v56 = vmul.f32 %v390_v53, %v377_v54  ;;  %v733_v57 = vpop.f32.mrb[17].mxu1 }
 0x1ec   :  { %v380_v58 = vpop.f32.mrb[18].mxu1 }
 0x1ed   :  { %v399_v59 = vadd.f32 %v644_v55, %v391_v56  ;;  %v734_v60 = vpop.f32.mrb[19].mxu1 }
 0x1ef   :  { %v400_v9 = vmax.f32 %v399_v59, 0.0 }
 0x1f1   :  { %v401_v61 = vpack.c.bf16 %v400_v9, %v400_v9 }
 0x1f3   :  { %772 = vmatmul.mubr.bf16.vlgmr.msra.gmra.mrb[0].mxu0 %v401_v61 }
 0x2c6   :  { %v605_v62 = vpop.f32.mrb[0].mxu0 }
 0x2c7   :  { %611 = vst [vmem:[#allocation7] sm:$0xff] %v605_v62  ;;  %v773_v63 = vpop.f32.mrb[1].mxu0 }
 0x2c8   :  { %v608_v0 = vpop.f32.mrb[2].mxu0 }
 0x2c9   :  { %843 = shalt.err (!%p840_p12)
}
 0x2ca   :  { %s844_s12 = scalar_lea.hbm %s1042_s8, 128 }
 0x2cb   :  { %p845_p13 = scmp.ne.s32.totalorder %s1042_s8, %s844_s12  ;;  %p848_p0 = scmp.lt.u32.totalorder %s844_s12, %s1042_s8 }
 0x2cd   :  { %p850_p1 = pnand %p848_p0, %p845_p13 }
 0x2cf   :  { %853 = shalt.err (!%p850_p1)
}
 0x2d0   :  { %621 = dma.vmem_to_hbm [thread:$0]  %s619_s6, 128, %s1042_s8, [#allocation6]   ;;  %v774_v1 = vpop.f32.mrb[3].mxu0 }
 0x2d1   :  { %856 = dma.done.wait [#allocation6], 128  }
 0x2d2   :  { %857 = vsyncadd [#allocation6], 4294967168 }
 0x2d3   :  { %625 = vsyncpa [#allocation5], 1 }
 0x2d4   :  { %626 = vsyncpa [#allocation6], 1 }

</bundles_post_ra>
